<compile_context>
chip_gen: v7x
topology: tpu7x:2x2x1
jax: 0.10.0
libtpu: 0.0.40
codegen_flags: <defaults>
</compile_context>

<pallas_src>
import jax
import jax.numpy as jnp
from jax.experimental import pallas as pl
from jax.experimental.pallas import tpu as pltpu


def _round_up(x, m):
    return (x + m - 1) // m * m


def _make_yolo_kernel(nA, attrib, anchors_px, stride):
    """anchors_px: list of (w, h) in original pixel units; stride: float."""
    stride = float(stride)

    def kernel(x_ref, mesh_ref, o_ref):
        # x_ref   : (C, T_HW)  raw network outputs (f32 or bf16)
        # mesh_ref: (2, T_HW)  row 0 = grid x (col idx), row 1 = grid y (row idx)
        # o_ref   : (C, T_HW)  decoded [bx, by, bw, bh, conf, cls...] per anchor
        x = x_ref[...].astype(jnp.float32)
        # Whole-tile sigmoid: one EUP push (tanh formulation, numerically
        # stable).  Correct for conf / class channels; box channels are
        # overwritten below.  Single unmasked lane-dense store.
        sig = 0.5 * jnp.tanh(0.5 * x) + 0.5
        o_ref[...] = sig.astype(o_ref.dtype)

        mesh_x = mesh_ref[pl.ds(0, 1), :]      # (1, T_HW)
        mesh_y = mesh_ref[pl.ds(1, 1), :]      # (1, T_HW)

        # Per-anchor box rows: all offsets/scales are Python scalars, so no
        # full-tile selector math is needed; exp runs only on the w/h rows.
        for a in range(nA):
            base = a * attrib
            aw, ah = anchors_px[a]

            tx = x_ref[pl.ds(base + 0, 1), :].astype(jnp.float32)
            ty = x_ref[pl.ds(base + 1, 1), :].astype(jnp.float32)
            sx = 0.5 * jnp.tanh(0.5 * tx) + 0.5
            sy = 0.5 * jnp.tanh(0.5 * ty) + 0.5
            o_ref[pl.ds(base + 0, 1), :] = ((sx + mesh_x) * stride).astype(o_ref.dtype)
            o_ref[pl.ds(base + 1, 1), :] = ((sy + mesh_y) * stride).astype(o_ref.dtype)

            tw = x_ref[pl.ds(base + 2, 1), :].astype(jnp.float32)
            th = x_ref[pl.ds(base + 3, 1), :].astype(jnp.float32)
            # NOTE: unclamped exp, matching the torch module's .exp().
            o_ref[pl.ds(base + 2, 1), :] = (jnp.exp(tw) * aw).astype(o_ref.dtype)
            o_ref[pl.ds(base + 3, 1), :] = (jnp.exp(th) * ah).astype(o_ref.dtype)

    return kernel


def yolo_layer_forward(x, anchors_all, anchors_mask, num_classes, img_dim, *,
                       t_hw_target=2048, out_dtype=None, channel_major=False):
    """Pallas implementation of YoloLayer.forward(x, img_dim, target=None).

    x: (nB, nA*(5+num_classes), nH, nW), NCHW (same as PyTorch), f32 or bf16.
    channel_major=False: returns (nB, nA*nH*nW, attrib)  (PyTorch contract).
    channel_major=True : returns (nB, C, nH, nW) decoded, no extra HBM permute.
    """
    nB, C, nH, nW = x.shape
    nA = len(anchors_mask)
    attrib = 5 + num_classes
    assert C == nA * attrib
    # Matches the torch module: stride = img_dim[1]/nH applied to both x and y
    # (only exactly right for square inputs, same as the reference).
    stride = float(img_dim[1]) / float(nH)
    HW = nH * nW
    if out_dtype is None:
        out_dtype = x.dtype

    # anchors in original pixel units: exp(wh) * (anchor/stride) * stride == exp(wh) * anchor
    anchors_px = [(float(anchors_all[m][0]), float(anchors_all[m][1]))
                  for m in anchors_mask]

    # Lane tiling over flattened H*W.  No host-side padding: partial edge
    # blocks are masked by Pallas, so x streams through HBM exactly once.
    n_lane_tiles = pl.cdiv(HW, 128)
    grid_t = max(1, pl.cdiv(HW, t_hw_target))
    if nB * grid_t < 2 and n_lane_tiles >= 2:
        grid_t = 2                     # >= 2 grid steps -> DMA/compute overlap
    T_HW = _round_up(pl.cdiv(HW, grid_t), 128)
    grid_t = pl.cdiv(HW, T_HW)

    x_flat = x.reshape(nB, C, HW)      # NCHW -> channel-major flat (free)

    # flattened meshgrid: mesh_x[hw] = hw % nW, mesh_y[hw] = hw // nW
    hw = jnp.arange(HW, dtype=jnp.int32)
    mesh = jnp.stack([(hw % nW).astype(jnp.float32),
                      (hw // nW).astype(jnp.float32)], axis=0)  # (2, HW)

    kernel = _make_yolo_kernel(nA, attrib, anchors_px, stride)

    out_raw = pl.pallas_call(
        kernel,
        out_shape=jax.ShapeDtypeStruct((nB, C, HW), out_dtype),
        grid_spec=pltpu.PrefetchScalarGridSpec(
            num_scalar_prefetch=0,
            grid=(nB, grid_t),
            in_specs=[
                pl.BlockSpec((None, C, T_HW), lambda b, t: (b, 0, t)),
                pl.BlockSpec((2, T_HW), lambda b, t: (0, t)),
            ],
            out_specs=pl.BlockSpec((None, C, T_HW), lambda b, t: (b, 0, t)),
        ),
        compiler_params=pltpu.CompilerParams(
            dimension_semantics=("parallel", "parallel")),
    )(x_flat, mesh)

    if channel_major:
        # Fast path: decoded tensor in the network's own NCHW layout; the
        # consumer (confidence threshold / NMS) should read this directly.
        return out_raw.reshape(nB, C, nH, nW)

    # PyTorch output contract: (nB, nA*nH*nW, attrib).  This permute re-streams
    # the tensor through HBM once in XLA; prefer channel_major=True and fuse
    # the permute into the consumer (or apply it after confidence filtering).
    out = (out_raw.reshape(nB, nA, attrib, nH, nW)
           .transpose(0, 3, 4, 1, 2)
           .reshape(nB, nA * nH * nW, attrib))
    return out


def yolo_layer_reference(x, anchors_all, anchors_mask, num_classes, img_dim):
    """Pure-JAX mirror of the torch forward (target=None) for verification."""
    nB, C, nH, nW = x.shape
    nA = len(anchors_mask)
    attrib = 5 + num_classes
    stride = float(img_dim[1]) / float(nH)
    anchors = (jnp.asarray(anchors_all, jnp.float32)[jnp.asarray(anchors_mask)]
               / stride)  # (nA, 2)
    preds = x.astype(jnp.float32).reshape(nB, nA, attrib, nH, nW).transpose(0, 1, 3, 4, 2)
    preds_xy = jax.nn.sigmoid(preds[..., :2])
    preds_wh = preds[..., 2:4]
    preds_conf = jax.nn.sigmoid(preds[..., 4:5])
    preds_cls = jax.nn.sigmoid(preds[..., 5:])
    mesh_y, mesh_x = jnp.meshgrid(jnp.arange(nH), jnp.arange(nW), indexing="ij")
    mesh_xy = jnp.stack((mesh_x, mesh_y), axis=2).astype(jnp.float32)  # (nH,nW,2)
    mesh_anchors = anchors.reshape(1, nA, 1, 1, 2)
    box_xy = preds_xy + mesh_xy
    box_wh = jnp.exp(preds_wh) * mesh_anchors
    pred_boxes = jnp.concatenate([box_xy, box_wh], axis=-1)
    out = jnp.concatenate([pred_boxes * stride, preds_conf, preds_cls], axis=4)
    out = out.transpose(0, 2, 3, 1, 4).reshape(nB, nA * nH * nW, attrib)
    return out


if __name__ == "__main__":
    anchors_all = [(10., 13.), (16., 30.), (33., 23.),
                   (30., 61.), (62., 45.), (59., 119.),
                   (116., 90.), (156., 198.), (373., 326.)]
    key = jax.random.PRNGKey(0)

    # Config A: 128-aligned HW, C multiple of 8, nB=2.
    num_classes_a, mask_a = 3, [0, 1, 2]
    nB, nH, nW = 2, 16, 16
    attrib_a = 5 + num_classes_a
    nA_a = len(mask_a)
    img_dim_a = (nW * 8, nH * 8)  # stride = 8
    key, k1 = jax.random.split(key)
    xa = 0.5 * jax.random.normal(k1, (nB, nA_a * attrib_a, nH, nW), dtype=jnp.float32)
    out_a = jax.block_until_ready(
        yolo_layer_forward(xa, anchors_all, mask_a, num_classes_a, img_dim_a))
    ref_a = jax.block_until_ready(
        yolo_layer_reference(xa, anchors_all, mask_a, num_classes_a, img_dim_a))
    assert out_a.shape == (nB, nA_a * nH * nW, attrib_a), out_a.shape
    assert jnp.allclose(out_a, ref_a, rtol=1e-3, atol=1e-3), "mismatch vs reference (A)"

    # Config A, channel-major fast path (no post-kernel HBM permute).
    out_a_cm = jax.block_until_ready(
        yolo_layer_forward(xa, anchors_all, mask_a, num_classes_a, img_dim_a,
                           channel_major=True))
    assert out_a_cm.shape == (nB, nA_a * attrib_a, nH, nW), out_a_cm.shape
    cm_as_torch = (out_a_cm.reshape(nB, nA_a, attrib_a, nH, nW)
                   .transpose(0, 3, 4, 1, 2)
                   .reshape(nB, nA_a * nH * nW, attrib_a))
    assert jnp.allclose(cm_as_torch, ref_a, rtol=1e-3, atol=1e-3), \
        "mismatch vs reference (A, channel-major)"

    # Config B: non-128-aligned HW (13x13), C not a multiple of 8, nB=1 ->
    # exercises partial edge blocks, unaligned-row stores, and the >=2-step
    # grid split for small heads.
    num_classes_b, mask_b = 2, [3, 4, 5]
    nBb, nHb, nWb = 1, 13, 13
    attrib_b = 5 + num_classes_b
    nA_b = len(mask_b)
    img_dim_b = (nWb * 32, nHb * 32)  # stride = 32
    key, k2 = jax.random.split(key)
    xb = 0.5 * jax.random.normal(k2, (nBb, nA_b * attrib_b, nHb, nWb), dtype=jnp.float32)
    out_b = jax.block_until_ready(
        yolo_layer_forward(xb, anchors_all, mask_b, num_classes_b, img_dim_b))
    ref_b = jax.block_until_ready(
        yolo_layer_reference(xb, anchors_all, mask_b, num_classes_b, img_dim_b))
    assert out_b.shape == (nBb, nA_b * nHb * nWb, attrib_b), out_b.shape
    assert jnp.allclose(out_b, ref_b, rtol=1e-3, atol=1e-3), "mismatch vs reference (B)"

    # Config B, bf16 output path (f32 compute inside the kernel, bf16 store).
    out_b_bf16 = jax.block_until_ready(
        yolo_layer_forward(xb, anchors_all, mask_b, num_classes_b, img_dim_b,
                           out_dtype=jnp.bfloat16))
    assert out_b_bf16.dtype == jnp.bfloat16
    assert jnp.allclose(out_b_bf16.astype(jnp.float32), ref_b, rtol=2e-2, atol=5e-2), \
        "mismatch vs reference (B, bf16 out)"

    print("KERNEL_OK")
</pallas_src>

<mosaic_0001>
module attributes {stable_mosaic.version = 11 : i64} {
  func.func @kernel(%arg0: i32, %arg1: i32, %arg2: memref<1x24x256xf32, #tpu.memory_space<vmem>>, %arg3: memref<2x256xf32, #tpu.memory_space<vmem>>, %arg4: memref<1x24x256xf32, #tpu.memory_space<vmem>>) attributes {dimension_semantics = [#tpu.dimension_semantics<parallel>, #tpu.dimension_semantics<parallel>], iteration_bounds = array<i64: 2, 1>, scalar_prefetch = 0 : i64, scratch_operands = 0 : i64, tpu.core_type = #tpu.core_type<tc>, window_params = [{transform_indices = @transform_0, window_bounds = array<i64: 1, 24, 256>}, {transform_indices = @transform_1, window_bounds = array<i64: 2, 256>}, {transform_indices = @transform_2, window_bounds = array<i64: 1, 24, 256>}]} {
    %c0 = arith.constant 0 : index
    %c0_0 = arith.constant 0 : index
    %c0_1 = arith.constant 0 : index
    %0 = vector.load %arg2[%c0, %c0_0, %c0_1] : memref<1x24x256xf32, #tpu.memory_space<vmem>>, vector<1x24x256xf32>
    %1 = vector.shape_cast %0 : vector<1x24x256xf32> to vector<24x256xf32>
    %cst = arith.constant 5.000000e-01 : f32
    %2 = vector.broadcast %cst : f32 to vector<24x256xf32>
    %3 = arith.mulf %2, %1 : vector<24x256xf32>
    %4 = math.tanh %3 : vector<24x256xf32>
    %cst_2 = arith.constant 5.000000e-01 : f32
    %5 = vector.broadcast %cst_2 : f32 to vector<24x256xf32>
    %6 = arith.mulf %5, %4 : vector<24x256xf32>
    %cst_3 = arith.constant 5.000000e-01 : f32
    %7 = vector.broadcast %cst_3 : f32 to vector<24x256xf32>
    %8 = arith.addf %6, %7 : vector<24x256xf32>
    %c0_4 = arith.constant 0 : index
    %c0_5 = arith.constant 0 : index
    %c0_6 = arith.constant 0 : index
    %9 = vector.load %arg4[%c0_4, %c0_5, %c0_6] : memref<1x24x256xf32, #tpu.memory_space<vmem>>, vector<1x24x256xf32>
    %10 = vector.shape_cast %9 : vector<1x24x256xf32> to vector<24x256xf32>
    %11 = vector.shape_cast %8 : vector<24x256xf32> to vector<1x24x256xf32>
    tpu.vector_store %arg4[%c0_4, %c0_5, %c0_6], %11 {strides = array<i32>} : memref<1x24x256xf32, #tpu.memory_space<vmem>>, vector<1x24x256xf32>,
    %c0_7 = arith.constant 0 : index
    %c0_8 = arith.constant 0 : index
    %12 = vector.load %arg3[%c0_7, %c0_8] : memref<2x256xf32, #tpu.memory_space<vmem>>, vector<1x256xf32>
    %c1 = arith.constant 1 : index
    %c0_9 = arith.constant 0 : index
    %13 = vector.load %arg3[%c1, %c0_9] : memref<2x256xf32, #tpu.memory_space<vmem>>, vector<1x256xf32>
    %c0_10 = arith.constant 0 : index
    %c0_11 = arith.constant 0 : index
    %c0_12 = arith.constant 0 : index
    %14 = vector.load %arg2[%c0_10, %c0_11, %c0_12] : memref<1x24x256xf32, #tpu.memory_space<vmem>>, vector<1x1x256xf32>
    %15 = vector.shape_cast %14 : vector<1x1x256xf32> to vector<1x256xf32>
    %c0_13 = arith.constant 0 : index
    %c1_14 = arith.constant 1 : index
    %c0_15 = arith.constant 0 : index
    %16 = vector.load %arg2[%c0_13, %c1_14, %c0_15] : memref<1x24x256xf32, #tpu.memory_space<vmem>>, vector<1x1x256xf32>
    %17 = vector.shape_cast %16 : vector<1x1x256xf32> to vector<1x256xf32>
    %cst_16 = arith.constant 5.000000e-01 : f32
    %18 = vector.broadcast %cst_16 : f32 to vector<1x256xf32>
    %19 = arith.mulf %18, %15 : vector<1x256xf32>
    %20 = math.tanh %19 : vector<1x256xf32>
    %cst_17 = arith.constant 5.000000e-01 : f32
    %21 = vector.broadcast %cst_17 : f32 to vector<1x256xf32>
    %22 = arith.mulf %21, %20 : vector<1x256xf32>
    %cst_18 = arith.constant 5.000000e-01 : f32
    %23 = vector.broadcast %cst_18 : f32 to vector<1x256xf32>
    %24 = arith.addf %22, %23 : vector<1x256xf32>
    %cst_19 = arith.constant 5.000000e-01 : f32
    %25 = vector.broadcast %cst_19 : f32 to vector<1x256xf32>
    %26 = arith.mulf %25, %17 : vector<1x256xf32>
    %27 = math.tanh %26 : vector<1x256xf32>
    %cst_20 = arith.constant 5.000000e-01 : f32
    %28 = vector.broadcast %cst_20 : f32 to vector<1x256xf32>
    %29 = arith.mulf %28, %27 : vector<1x256xf32>
    %cst_21 = arith.constant 5.000000e-01 : f32
    %30 = vector.broadcast %cst_21 : f32 to vector<1x256xf32>
    %31 = arith.addf %29, %30 : vector<1x256xf32>
    %32 = arith.addf %24, %12 : vector<1x256xf32>
    %cst_22 = arith.constant 8.000000e+00 : f32
    %33 = vector.broadcast %cst_22 : f32 to vector<1x256xf32>
    %34 = arith.mulf %32, %33 : vector<1x256xf32>
    %c0_23 = arith.constant 0 : index
    %c0_24 = arith.constant 0 : index
    %c0_25 = arith.constant 0 : index
    %35 = vector.load %arg4[%c0_23, %c0_24, %c0_25] : memref<1x24x256xf32, #tpu.memory_space<vmem>>, vector<1x1x256xf32>
    %36 = vector.shape_cast %35 : vector<1x1x256xf32> to vector<1x256xf32>
    %37 = vector.shape_cast %34 : vector<1x256xf32> to vector<1x1x256xf32>
    tpu.vector_store %arg4[%c0_23, %c0_24, %c0_25], %37 {strides = array<i32>} : memref<1x24x256xf32, #tpu.memory_space<vmem>>, vector<1x1x256xf32>,
    %38 = arith.addf %31, %13 : vector<1x256xf32>
    %cst_26 = arith.constant 8.000000e+00 : f32
    %39 = vector.broadcast %cst_26 : f32 to vector<1x256xf32>
    %40 = arith.mulf %38, %39 : vector<1x256xf32>
    %c0_27 = arith.constant 0 : index
    %c1_28 = arith.constant 1 : index
    %c0_29 = arith.constant 0 : index
    %41 = vector.load %arg4[%c0_27, %c1_28, %c0_29] : memref<1x24x256xf32, #tpu.memory_space<vmem>>, vector<1x1x256xf32>
    %42 = vector.shape_cast %41 : vector<1x1x256xf32> to vector<1x256xf32>
    %43 = vector.shape_cast %40 : vector<1x256xf32> to vector<1x1x256xf32>
    tpu.vector_store %arg4[%c0_27, %c1_28, %c0_29], %43 {strides = array<i32>} : memref<1x24x256xf32, #tpu.memory_space<vmem>>, vector<1x1x256xf32>,
    %c0_30 = arith.constant 0 : index
    %c2 = arith.constant 2 : index
    %c0_31 = arith.constant 0 : index
    %44 = vector.load %arg2[%c0_30, %c2, %c0_31] : memref<1x24x256xf32, #tpu.memory_space<vmem>>, vector<1x1x256xf32>
    %45 = vector.shape_cast %44 : vector<1x1x256xf32> to vector<1x256xf32>
    %c0_32 = arith.constant 0 : index
    %c3 = arith.constant 3 : index
    %c0_33 = arith.constant 0 : index
    %46 = vector.load %arg2[%c0_32, %c3, %c0_33] : memref<1x24x256xf32, #tpu.memory_space<vmem>>, vector<1x1x256xf32>
    %47 = vector.shape_cast %46 : vector<1x1x256xf32> to vector<1x256xf32>
    %48 = math.exp %45 : vector<1x256xf32>
    %cst_34 = arith.constant 1.000000e+01 : f32
    %49 = vector.broadcast %cst_34 : f32 to vector<1x256xf32>
    %50 = arith.mulf %48, %49 : vector<1x256xf32>
    %c0_35 = arith.constant 0 : index
    %c2_36 = arith.constant 2 : index
    %c0_37 = arith.constant 0 : index
    %51 = vector.load %arg4[%c0_35, %c2_36, %c0_37] : memref<1x24x256xf32, #tpu.memory_space<vmem>>, vector<1x1x256xf32>
    %52 = vector.shape_cast %51 : vector<1x1x256xf32> to vector<1x256xf32>
    %53 = vector.shape_cast %50 : vector<1x256xf32> to vector<1x1x256xf32>
    tpu.vector_store %arg4[%c0_35, %c2_36, %c0_37], %53 {strides = array<i32>} : memref<1x24x256xf32, #tpu.memory_space<vmem>>, vector<1x1x256xf32>,
    %54 = math.exp %47 : vector<1x256xf32>
    %cst_38 = arith.constant 1.300000e+01 : f32
    %55 = vector.broadcast %cst_38 : f32 to vector<1x256xf32>
    %56 = arith.mulf %54, %55 : vector<1x256xf32>
    %c0_39 = arith.constant 0 : index
    %c3_40 = arith.constant 3 : index
    %c0_41 = arith.constant 0 : index
    %57 = vector.load %arg4[%c0_39, %c3_40, %c0_41] : memref<1x24x256xf32, #tpu.memory_space<vmem>>, vector<1x1x256xf32>
    %58 = vector.shape_cast %57 : vector<1x1x256xf32> to vector<1x256xf32>
    %59 = vector.shape_cast %56 : vector<1x256xf32> to vector<1x1x256xf32>
    tpu.vector_store %arg4[%c0_39, %c3_40, %c0_41], %59 {strides = array<i32>} : memref<1x24x256xf32, #tpu.memory_space<vmem>>, vector<1x1x256xf32>,
    %c0_42 = arith.constant 0 : index
    %c8 = arith.constant 8 : index
    %c0_43 = arith.constant 0 : index
    %60 = vector.load %arg2[%c0_42, %c8, %c0_43] : memref<1x24x256xf32, #tpu.memory_space<vmem>>, vector<1x1x256xf32>
    %61 = vector.shape_cast %60 : vector<1x1x256xf32> to vector<1x256xf32>
    %c0_44 = arith.constant 0 : index
    %c9 = arith.constant 9 : index
    %c0_45 = arith.constant 0 : index
    %62 = vector.load %arg2[%c0_44, %c9, %c0_45] : memref<1x24x256xf32, #tpu.memory_space<vmem>>, vector<1x1x256xf32>
    %63 = vector.shape_cast %62 : vector<1x1x256xf32> to vector<1x256xf32>
    %cst_46 = arith.constant 5.000000e-01 : f32
    %64 = vector.broadcast %cst_46 : f32 to vector<1x256xf32>
    %65 = arith.mulf %64, %61 : vector<1x256xf32>
    %66 = math.tanh %65 : vector<1x256xf32>
    %cst_47 = arith.constant 5.000000e-01 : f32
    %67 = vector.broadcast %cst_47 : f32 to vector<1x256xf32>
    %68 = arith.mulf %67, %66 : vector<1x256xf32>
    %cst_48 = arith.constant 5.000000e-01 : f32
    %69 = vector.broadcast %cst_48 : f32 to vector<1x256xf32>
    %70 = arith.addf %68, %69 : vector<1x256xf32>
    %cst_49 = arith.constant 5.000000e-01 : f32
    %71 = vector.broadcast %cst_49 : f32 to vector<1x256xf32>
    %72 = arith.mulf %71, %63 : vector<1x256xf32>
    %73 = math.tanh %72 : vector<1x256xf32>
    %cst_50 = arith.constant 5.000000e-01 : f32
    %74 = vector.broadcast %cst_50 : f32 to vector<1x256xf32>
    %75 = arith.mulf %74, %73 : vector<1x256xf32>
    %cst_51 = arith.constant 5.000000e-01 : f32
    %76 = vector.broadcast %cst_51 : f32 to vector<1x256xf32>
    %77 = arith.addf %75, %76 : vector<1x256xf32>
    %78 = arith.addf %70, %12 : vector<1x256xf32>
    %cst_52 = arith.constant 8.000000e+00 : f32
    %79 = vector.broadcast %cst_52 : f32 to vector<1x256xf32>
    %80 = arith.mulf %78, %79 : vector<1x256xf32>
    %c0_53 = arith.constant 0 : index
    %c8_54 = arith.constant 8 : index
    %c0_55 = arith.constant 0 : index
    %81 = vector.load %arg4[%c0_53, %c8_54, %c0_55] : memref<1x24x256xf32, #tpu.memory_space<vmem>>, vector<1x1x256xf32>
    %82 = vector.shape_cast %81 : vector<1x1x256xf32> to vector<1x256xf32>
    %83 = vector.shape_cast %80 : vector<1x256xf32> to vector<1x1x256xf32>
    tpu.vector_store %arg4[%c0_53, %c8_54, %c0_55], %83 {strides = array<i32>} : memref<1x24x256xf32, #tpu.memory_space<vmem>>, vector<1x1x256xf32>,
    %84 = arith.addf %77, %13 : vector<1x256xf32>
    %cst_56 = arith.constant 8.000000e+00 : f32
    %85 = vector.broadcast %cst_56 : f32 to vector<1x256xf32>
    %86 = arith.mulf %84, %85 : vector<1x256xf32>
    %c0_57 = arith.constant 0 : index
    %c9_58 = arith.constant 9 : index
    %c0_59 = arith.constant 0 : index
    %87 = vector.load %arg4[%c0_57, %c9_58, %c0_59] : memref<1x24x256xf32, #tpu.memory_space<vmem>>, vector<1x1x256xf32>
    %88 = vector.shape_cast %87 : vector<1x1x256xf32> to vector<1x256xf32>
    %89 = vector.shape_cast %86 : vector<1x256xf32> to vector<1x1x256xf32>
    tpu.vector_store %arg4[%c0_57, %c9_58, %c0_59], %89 {strides = array<i32>} : memref<1x24x256xf32, #tpu.memory_space<vmem>>, vector<1x1x256xf32>,
    %c0_60 = arith.constant 0 : index
    %c10 = arith.constant 10 : index
    %c0_61 = arith.constant 0 : index
    %90 = vector.load %arg2[%c0_60, %c10, %c0_61] : memref<1x24x256xf32, #tpu.memory_space<vmem>>, vector<1x1x256xf32>
    %91 = vector.shape_cast %90 : vector<1x1x256xf32> to vector<1x256xf32>
    %c0_62 = arith.constant 0 : index
    %c11 = arith.constant 11 : index
    %c0_63 = arith.constant 0 : index
    %92 = vector.load %arg2[%c0_62, %c11, %c0_63] : memref<1x24x256xf32, #tpu.memory_space<vmem>>, vector<1x1x256xf32>
    %93 = vector.shape_cast %92 : vector<1x1x256xf32> to vector<1x256xf32>
    %94 = math.exp %91 : vector<1x256xf32>
    %cst_64 = arith.constant 1.600000e+01 : f32
    %95 = vector.broadcast %cst_64 : f32 to vector<1x256xf32>
    %96 = arith.mulf %94, %95 : vector<1x256xf32>
    %c0_65 = arith.constant 0 : index
    %c10_66 = arith.constant 10 : index
    %c0_67 = arith.constant 0 : index
    %97 = vector.load %arg4[%c0_65, %c10_66, %c0_67] : memref<1x24x256xf32, #tpu.memory_space<vmem>>, vector<1x1x256xf32>
    %98 = vector.shape_cast %97 : vector<1x1x256xf32> to vector<1x256xf32>
    %99 = vector.shape_cast %96 : vector<1x256xf32> to vector<1x1x256xf32>
    tpu.vector_store %arg4[%c0_65, %c10_66, %c0_67], %99 {strides = array<i32>} : memref<1x24x256xf32, #tpu.memory_space<vmem>>, vector<1x1x256xf32>,
    %100 = math.exp %93 : vector<1x256xf32>
    %cst_68 = arith.constant 3.000000e+01 : f32
    %101 = vector.broadcast %cst_68 : f32 to vector<1x256xf32>
    %102 = arith.mulf %100, %101 : vector<1x256xf32>
    %c0_69 = arith.constant 0 : index
    %c11_70 = arith.constant 11 : index
    %c0_71 = arith.constant 0 : index
    %103 = vector.load %arg4[%c0_69, %c11_70, %c0_71] : memref<1x24x256xf32, #tpu.memory_space<vmem>>, vector<1x1x256xf32>
    %104 = vector.shape_cast %103 : vector<1x1x256xf32> to vector<1x256xf32>
    %105 = vector.shape_cast %102 : vector<1x256xf32> to vector<1x1x256xf32>
    tpu.vector_store %arg4[%c0_69, %c11_70, %c0_71], %105 {strides = array<i32>} : memref<1x24x256xf32, #tpu.memory_space<vmem>>, vector<1x1x256xf32>,
    %c0_72 = arith.constant 0 : index
    %c16 = arith.constant 16 : index
    %c0_73 = arith.constant 0 : index
    %106 = vector.load %arg2[%c0_72, %c16, %c0_73] : memref<1x24x256xf32, #tpu.memory_space<vmem>>, vector<1x1x256xf32>
    %107 = vector.shape_cast %106 : vector<1x1x256xf32> to vector<1x256xf32>
    %c0_74 = arith.constant 0 : index
    %c17 = arith.constant 17 : index
    %c0_75 = arith.constant 0 : index
    %108 = vector.load %arg2[%c0_74, %c17, %c0_75] : memref<1x24x256xf32, #tpu.memory_space<vmem>>, vector<1x1x256xf32>
    %109 = vector.shape_cast %108 : vector<1x1x256xf32> to vector<1x256xf32>
    %cst_76 = arith.constant 5.000000e-01 : f32
    %110 = vector.broadcast %cst_76 : f32 to vector<1x256xf32>
    %111 = arith.mulf %110, %107 : vector<1x256xf32>
    %112 = math.tanh %111 : vector<1x256xf32>
    %cst_77 = arith.constant 5.000000e-01 : f32
    %113 = vector.broadcast %cst_77 : f32 to vector<1x256xf32>
    %114 = arith.mulf %113, %112 : vector<1x256xf32>
    %cst_78 = arith.constant 5.000000e-01 : f32
    %115 = vector.broadcast %cst_78 : f32 to vector<1x256xf32>
    %116 = arith.addf %114, %115 : vector<1x256xf32>
    %cst_79 = arith.constant 5.000000e-01 : f32
    %117 = vector.broadcast %cst_79 : f32 to vector<1x256xf32>
    %118 = arith.mulf %117, %109 : vector<1x256xf32>
    %119 = math.tanh %118 : vector<1x256xf32>
    %cst_80 = arith.constant 5.000000e-01 : f32
    %120 = vector.broadcast %cst_80 : f32 to vector<1x256xf32>
    %121 = arith.mulf %120, %119 : vector<1x256xf32>
    %cst_81 = arith.constant 5.000000e-01 : f32
    %122 = vector.broadcast %cst_81 : f32 to vector<1x256xf32>
    %123 = arith.addf %121, %122 : vector<1x256xf32>
    %124 = arith.addf %116, %12 : vector<1x256xf32>
    %cst_82 = arith.constant 8.000000e+00 : f32
    %125 = vector.broadcast %cst_82 : f32 to vector<1x256xf32>
    %126 = arith.mulf %124, %125 : vector<1x256xf32>
    %c0_83 = arith.constant 0 : index
    %c16_84 = arith.constant 16 : index
    %c0_85 = arith.constant 0 : index
    %127 = vector.load %arg4[%c0_83, %c16_84, %c0_85] : memref<1x24x256xf32, #tpu.memory_space<vmem>>, vector<1x1x256xf32>
    %128 = vector.shape_cast %127 : vector<1x1x256xf32> to vector<1x256xf32>
    %129 = vector.shape_cast %126 : vector<1x256xf32> to vector<1x1x256xf32>
    tpu.vector_store %arg4[%c0_83, %c16_84, %c0_85], %129 {strides = array<i32>} : memref<1x24x256xf32, #tpu.memory_space<vmem>>, vector<1x1x256xf32>,
    %130 = arith.addf %123, %13 : vector<1x256xf32>
    %cst_86 = arith.constant 8.000000e+00 : f32
    %131 = vector.broadcast %cst_86 : f32 to vector<1x256xf32>
    %132 = arith.mulf %130, %131 : vector<1x256xf32>
    %c0_87 = arith.constant 0 : index
    %c17_88 = arith.constant 17 : index
    %c0_89 = arith.constant 0 : index
    %133 = vector.load %arg4[%c0_87, %c17_88, %c0_89] : memref<1x24x256xf32, #tpu.memory_space<vmem>>, vector<1x1x256xf32>
    %134 = vector.shape_cast %133 : vector<1x1x256xf32> to vector<1x256xf32>
    %135 = vector.shape_cast %132 : vector<1x256xf32> to vector<1x1x256xf32>
    tpu.vector_store %arg4[%c0_87, %c17_88, %c0_89], %135 {strides = array<i32>} : memref<1x24x256xf32, #tpu.memory_space<vmem>>, vector<1x1x256xf32>,
    %c0_90 = arith.constant 0 : index
    %c18 = arith.constant 18 : index
    %c0_91 = arith.constant 0 : index
    %136 = vector.load %arg2[%c0_90, %c18, %c0_91] : memref<1x24x256xf32, #tpu.memory_space<vmem>>, vector<1x1x256xf32>
    %137 = vector.shape_cast %136 : vector<1x1x256xf32> to vector<1x256xf32>
    %c0_92 = arith.constant 0 : index
    %c19 = arith.constant 19 : index
    %c0_93 = arith.constant 0 : index
    %138 = vector.load %arg2[%c0_92, %c19, %c0_93] : memref<1x24x256xf32, #tpu.memory_space<vmem>>, vector<1x1x256xf32>
    %139 = vector.shape_cast %138 : vector<1x1x256xf32> to vector<1x256xf32>
    %140 = math.exp %137 : vector<1x256xf32>
    %cst_94 = arith.constant 3.300000e+01 : f32
    %141 = vector.broadcast %cst_94 : f32 to vector<1x256xf32>
    %142 = arith.mulf %140, %141 : vector<1x256xf32>
    %c0_95 = arith.constant 0 : index
    %c18_96 = arith.constant 18 : index
    %c0_97 = arith.constant 0 : index
    %143 = vector.load %arg4[%c0_95, %c18_96, %c0_97] : memref<1x24x256xf32, #tpu.memory_space<vmem>>, vector<1x1x256xf32>
    %144 = vector.shape_cast %143 : vector<1x1x256xf32> to vector<1x256xf32>
    %145 = vector.shape_cast %142 : vector<1x256xf32> to vector<1x1x256xf32>
    tpu.vector_store %arg4[%c0_95, %c18_96, %c0_97], %145 {strides = array<i32>} : memref<1x24x256xf32, #tpu.memory_space<vmem>>, vector<1x1x256xf32>,
    %146 = math.exp %139 : vector<1x256xf32>
    %cst_98 = arith.constant 2.300000e+01 : f32
    %147 = vector.broadcast %cst_98 : f32 to vector<1x256xf32>
    %148 = arith.mulf %146, %147 : vector<1x256xf32>
    %c0_99 = arith.constant 0 : index
    %c19_100 = arith.constant 19 : index
    %c0_101 = arith.constant 0 : index
    %149 = vector.load %arg4[%c0_99, %c19_100, %c0_101] : memref<1x24x256xf32, #tpu.memory_space<vmem>>, vector<1x1x256xf32>
    %150 = vector.shape_cast %149 : vector<1x1x256xf32> to vector<1x256xf32>
    %151 = vector.shape_cast %148 : vector<1x256xf32> to vector<1x1x256xf32>
    tpu.vector_store %arg4[%c0_99, %c19_100, %c0_101], %151 {strides = array<i32>} : memref<1x24x256xf32, #tpu.memory_space<vmem>>, vector<1x1x256xf32>,
    return
  }
  func.func @transform_0(%arg0: i32, %arg1: i32) -> (i32, i32, i32) {
    %c0_i32 = arith.constant 0 : i32
    %c0_i32_0 = arith.constant 0 : i32
    return %arg0, %c0_i32, %arg1 : i32, i32, i32
  }
  func.func @transform_1(%arg0: i32, %arg1: i32) -> (i32, i32) {
    %c0_i32 = arith.constant 0 : i32
    %c0_i32_0 = arith.constant 0 : i32
    return %c0_i32, %arg1 : i32, i32
  }
  func.func @transform_2(%arg0: i32, %arg1: i32) -> (i32, i32, i32) {
    %c0_i32 = arith.constant 0 : i32
    %c0_i32_0 = arith.constant 0 : i32
    return %arg0, %c0_i32, %arg1 : i32, i32, i32
  }
}

</mosaic_0001>

<bundles_post_ra>
// kernel: tpu_custom_call.1
= control target key start
LH: loop header
LB: loop body
LE: loop exit
PB: predicated region body
PF: predicated region fallthrough
CT: control target
= control target key end

     0   :  { %7 = vsyncpa [#allocation3], 0  ;;  %s1086_s0 = inlined_call_operand.hbm [shape: f32[2,24,256], index: 0, kind: input, shape index: {}]   ;;  %s1087_s1 = inlined_call_operand.hbm [shape: f32[2,256], index: 1, kind: input, shape index: {}]   ;;  %s1088_s2 = inlined_call_operand.hbm [shape: f32[2,24,256], index: 2, kind: output, shape index: {}]  }
   0x1   :  { %9 = vsyncpa [#allocation3 + $0x1], 0 }
   0x2   :  { %10 = vsyncpa [#allocation6], 0 }
   0x3   :  { %11 = vsyncpa [#allocation4], 0 }
   0x4   :  { %13 = vsyncpa [#allocation4 + $0x1], 0  ;;  %s792_s9 = smov 0   ;;  %s794_s10 = smov 0  }
   0x5   :  { %s796_s11 = smov 0   ;;  %s798_s12 = smov 0  }
   0x6   :  { %s800_s13 = smov 0   ;;  %s802_s14 = smov 0  }
   0x7 LB: > { %s474_s15 = sadd.s32 4294967295, %s768_s14   ;;  %s475_s16 = sadd.s32 4294967294, %s768_s14   ;;  %s768_s14 = sphi %s802_s14, %s19_s14   ;;  %s764_s13 = sphi %s800_s13, %s1118_s13   ;;  %s760_s12 = sphi %s798_s12, %s1117_s12   ;;  %s756_s11 = sphi %s796_s11, %s1116_s11   ;;  %s752_s10 = sphi %s794_s10, %s1115_s10   ;;  %s748_s9 = sphi %s792_s9, %s1114_s9  }
   0x8   : > { %s40_s17 = sadd.s32 1, %s756_s11  ;;  %p47_p0 = scmp.ne.s32.totalorder %s756_s11, %s752_s10 }
   0x9   : > { %p48_p1 = scmp.eq.s32.totalorder %s768_s14, 0  ;;  %p53_p2 = scmp.ne.s32.totalorder %s752_s10, %s748_s9 }
   0xa   : > { %p830_p3 = scmp.eq.s32.totalorder %s474_s15, 0  ;;  %p105_p4 = scmp.eq.s32.totalorder %s474_s15, 1 }
   0xb   : > { %p834_p5 = por %p48_p1, %p47_p0  ;;  %p111_p6 = scmp.eq.s32.totalorder %s475_s16, 1 }
   0xc   : > { %s1095_s18 = scalar_select %p830_p3, 1, 0 }
   0xd   : > { %p840_p7 = por %p830_p3, %p53_p2  ;;  %p844_p8 = por %p105_p4, %p47_p0 }
   0xe   : > { %p848_p9 = por %p111_p6, %p53_p2  ;;  %p476_p10 = scmp.ge.s32.totalorder %s768_s14, 1 }
   0xf   : > { %s1097_s20 = scalar_select %p840_p7, 1, 0 }
  0x10   : > { %s1098_s21 = scalar_select %p844_p8, 1, 0 }
  0x11   : > { %s1099_s22 = scalar_select %p848_p9, 1, 0 }
  0x12   : > { %p118_p11 = scmp.lt.s32.totalorder %s768_s14, 3  ;;  %s770_s24 = smov [#allocation5]  }
  0x13   : > { %s134_s25 = sshll.u32 %s770_s24, 4  ;;  %p532_p1 = scmp.lt.s32.totalorder %s768_s14, 2  ;;  %s135_s25 = int_to_ptr.vmem [resolvable:$true] %s134_s25 }
  0x14   : > { %p855_p13 = pnand %p476_p10, %p118_p11  ;;  %s31_s28 = sadd.s32 1, %s764_s13 }
  0x15   : > { %p864_p4 = pnand %p532_p1, %p834_p5  ;;  %p875_p6 = scmp.ge.s32.totalorder %s31_s28, 2 }
  0x16   : > { %s1100_s23 = scalar_select %p855_p13, 1, 0 }
  0x17   : > { %p519_p0 = pneg %p855_p13  ;;  %s145_s30 = sand.u32 1, %s756_s11  }
  0x18   : > { %s1101_s26 = scalar_select %p864_p4, 1, 0 }
  0x19   : > { %p870_p2 = pnand %p519_p0, %p830_p3  ;;  %s624_s5 = scalar_lea.hbm %s1087_s1, 64 }
  0x1a   : > { %s1103_s29 = scalar_select %p875_p6, 1, 0 }
  0x1b   : > { %p625_p5 = scmp.ne.s32.totalorder %s1087_s1, %s624_s5  ;;  %p626_p10 = pneg %p870_p2 }
  0x1c   : > { %p631_p0 = scmp.lt.u32.totalorder %s624_s5, %s1087_s1 }
  0x1d   : > { %p627_p11 = pnand %p626_p10, %p625_p5 }
  0x1f   : > { %p628_p1 = pneg %p627_p11 }
  0x21   : > { %p633_p12 = pnand %p631_p0, %p628_p1 }
  0x23   : > { %636 = shalt.err (!%p633_p12)
}
  0x24   : > { %s637_s16 = scalar_lea.vmem %s135_s25, 64  ;;  %p645_p7 = scmp.lt.s32.totalorder %s135_s25, %s135_s25 }
  0x25   : > { %p638_p9 = scmp.ne.s32.totalorder %s135_s25, %s637_s16  ;;  %p646_p13 = scmp.lt.s32.totalorder %s637_s16, %s637_s16 }
  0x27   : > { %p640_p8 = pnand %p638_p9, %p626_p10  ;;  %p647_p4 = por %p646_p13, %p645_p7 }
  0x29   : > { %p641_p3 = pneg %p640_p8 }
  0x2b   : > { %p648_p6 = pnand %p647_p4, %p641_p3 }
  0x2d   : > { %651 = shalt.err (!%p648_p6)
}
  0x2e   : > { %522 = dma.hbm_to_vmem [thread:$0]  (!%p870_p2), %s1087_s1, 64, %s135_s25, [#allocation6]  }
  0x2f   : > { %p1104_p9 = scmp.ne.s32.totalorder %s1103_s29, 0  ;;  %s507_s3 = smul.u32 48, %s145_s30 }
  0x30   : > { %s508_s5 = smul.u32 768, %s764_s13  ;;  %s915_s29 = scalar_lea.sflag [#allocation3], %s145_s30 }
  0x31   : > { %s1120_s28 = smov (%p1104_p9, %s31_s28), 0  ;;  %s149_s8 = scalar_lea.vmem [#allocation2], %s507_s3 }
  0x32   : > { %s35_s4 = ssub.s32 %s764_s13, %s1120_s28  ;;  %s906_s7 = scalar_lea.hbm %s1086_s0, %s508_s5 }
  0x33   : > { %p38_p3 = scmp.eq.s32.totalorder %s35_s4, 0  ;;  %s158_s15 = sshll.u32 %s149_s8, 4  ;;  %s913_s15 = int_to_ptr.vmem [resolvable:$true] %s158_s15 }
  0x34   : > { %s652_s16 = scalar_lea.hbm %s906_s7, 768  ;;  %p1105_p8 = scmp.ne.s32.totalorder %s1101_s26, 0 }
  0x35   : > { %s911_s25 = scalar_select %p38_p3, %s756_s11, %s40_s17  }
  0x36   : > { %p653_p7 = scmp.ne.s32.totalorder %s906_s7, %s652_s16  ;;  %p654_p12 = pneg %p1105_p8 }
  0x37   : > { %s657_s3 = scalar_lea.hbm %s1086_s0, 1536  ;;  %p658_p2 = scmp.lt.u32.totalorder %s906_s7, %s1086_s0 }
  0x38   : > { %p655_p13 = pnand %p654_p12, %p653_p7  ;;  %p659_p6 = scmp.lt.u32.totalorder %s657_s3, %s652_s16 }
  0x39   : > { %p661_p10 = scmp.lt.u32.totalorder %s652_s16, %s906_s7 }
  0x3a   : > { %p656_p4 = pneg %p655_p13  ;;  %p660_p5 = por %p659_p6, %p658_p2 }
  0x3c   : > { %p662_p11 = por %p661_p10, %p660_p5 }
  0x3e   : > { %p663_p1 = pnand %p662_p11, %p656_p4 }
  0x40   : > { %666 = shalt.err (!%p663_p1)
}
  0x41   : > { %s667_s17 = scalar_lea.vmem %s913_s15, 768  ;;  %s771_s30 = smov [#allocation2]  }
  0x42   : > { %p668_p0 = scmp.ne.s32.totalorder %s913_s15, %s667_s17  ;;  %s672_s27 = sshll.u32 %s771_s30, 4  ;;  %s673_s27 = int_to_ptr.vmem [resolvable:$false] %s672_s27 }
  0x43   : > { %s674_s6 = scalar_lea.vmem %s673_s27, 1536  ;;  %p675_p7 = scmp.lt.s32.totalorder %s913_s15, %s673_s27 }
  0x44   : > { %p670_p9 = pnand %p668_p0, %p654_p12  ;;  %p676_p13 = scmp.lt.s32.totalorder %s674_s6, %s667_s17 }
  0x46   : > { %p671_p3 = pneg %p670_p9  ;;  %p677_p2 = por %p676_p13, %p675_p7 }
  0x48   : > { %p678_p6 = pnand %p677_p2, %p671_p3 }
  0x4a   : > { %681 = shalt.err (!%p678_p6)
}
  0x4b   : > { %s772_s8 = smov 256   ;;  %s773_s16 = smov 16  }
  0x4c   : > { %526 = dma.hbm_to_vmem [thread:$0]  (!%p1105_p8), %s906_s7, 768, %s913_s15, %s915_s29, %s772_s8, %s772_s8, %s773_s16  }
  0x4d   : > { %p1106_p12 = scmp.ne.s32.totalorder %s1100_s23, 0 }
  0x4e   : > { %s946_s19 = sand.u32 (!%p1106_p12), 1, %s752_s10   ;;  %p1107_p4 = scmp.ne.s32.totalorder (!%p1106_p12), %s1097_s20, 0 }
  0x4f   : > { %170 = sbr.rel (%p1106_p12) target bundleno = 142 (0x8e), region = 28  ;;  %s173_s3 = scalar_lea.sflag (!%p1106_p12), [#allocation3], %s946_s19 }
  0x50   : > { %s509_s24 = smul.u32 (!%p1106_p12), 48, %s946_s19 }
  0x52   : > { %s952_s4 = scalar_lea.vmem (!%p1106_p12), [#allocation2], %s509_s24 }
  0x56   : > { %735 = dma.done.wait (%p1107_p4), %s173_s3, 768  }
  0x57   : > { %737 = vsyncadd (%p1107_p4), %s173_s3, 4294966528  ;;  %p1108_p8 = scmp.ne.s32.totalorder %s1095_s18, 0 }
  0x59   : > { %739 = dma.done.wait (%p1108_p8), [#allocation6], 64  }
  0x5a   : > { %741 = vsyncadd (%p1108_p8), [#allocation6], 4294967232  ;;  %v204_v0 = vld [vmem:[%s952_s4] sm:$0xff]  ;;  %v205_v1 = vld [vmem:[%s952_s4 + $0x8] sm:$0xff]  ;;  %v256_v47 = vlaneseq  ;;  %s982_s18 = scalar_lea.vmem [#allocation7], %s509_s24  ;;  %s510_s20 = smul.u32 768, %s760_s12 }
  0x5b   : > { %v206_v2 = vld [vmem:[%s952_s4 + $0x10] sm:$0xff]  ;;  %v210_v3 = vmul.f32 0.5, %v204_v0  ;;  %v211_v4 = vmul.f32 0.5, %v205_v1  ;;  %v207_v6 = vld [vmem:[%s952_s4 + $0x18] sm:$0xff]  ;;  %v208_v7 = vld [vmem:[%s952_s4 + $0x20] sm:$0xff]  ;;  %s375_s23 = sshll.u32 %s982_s18, 4  ;;  %s1026_s23 = int_to_ptr.vmem [resolvable:$true] %s375_s23 }
  0x5c   : > { %v212_v5 = vmul.f32 0.5, %v206_v2  ;;  %v209_v8 = vld [vmem:[%s952_s4 + $0x28] sm:$0xff]  ;;  %v213_v9 = vmul.f32 0.5, %v207_v6  ;;  %v214_v10 = vmul.f32 0.5, %v208_v7  ;;  %vm988_vm0 = vcmp.lt.s32.totalorder %v256_v47, 256  ;;  %s1031_s7 = scalar_lea.hbm %s1088_s2, %s510_s20  ;;  %s360_s15 = scalar_lea.sflag [#allocation4], %s946_s19 }
  0x5d   : > { %588 = vtanh.f32 %v210_v3  ;;  %v243_v11 = vld [vmem:[%s952_s4] ss:$8 sm:$0x3]  ;;  %v215_v12 = vmul.f32 0.5, %v209_v8  ;;  %s682_s29 = scalar_lea.vmem %s1026_s23, 768  ;;  %p1111_p10 = scmp.ne.s32.totalorder %s1098_s21, 0 }
  0x5e   : > { %590 = vtanh.f32 %v211_v4  ;;  %v482_v13 = vld [vmem:[%s952_s4 + $0x1] ss:$8 sm:$0x3]  ;;  %v246_v14 = vmul.f32 0.5, %v243_v11  ;;  %p683_p5 = scmp.ne.s32.totalorder %s1026_s23, %s682_s29  ;;  %s774_s5 = smov [#allocation7]  }
  0x5f   : > { %592 = vtanh.f32 %v212_v5  ;;  %v484_v15 = vld [vmem:[%s952_s4 + $0x2] ss:$8 sm:$0x3]  ;;  %v250_v16 = vmul.f32 0.5, %v482_v13  ;;  %s686_s17 = sshll.u32 %s774_s5, 4  ;;  %s687_s17 = int_to_ptr.vmem [resolvable:$false] %s686_s17 }
  0x60   : > { %594 = vtanh.f32 %v213_v9  ;;  %v485_v17 = vld [vmem:[%s952_s4 + $0x3] ss:$8 sm:$0x3]  ;;  %v271_v18 = vmul.f32 1.442695, %v484_v15  ;;  %p684_p11 = pnand %p683_p5, %p1111_p10  ;;  %s688_s30 = scalar_lea.vmem %s687_s17, 1536 }
  0x61   : > { %596 = vtanh.f32 %v214_v10  ;;  %v488_v19 = vld [vmem:[%s952_s4 + $0x10] ss:$8 sm:$0x3]  ;;  %v277_v20 = vmul.f32 1.442695, %v485_v17  ;;  %p689_p0 = scmp.lt.s32.totalorder %s1026_s23, %s687_s17  ;;  %p690_p9 = scmp.lt.s32.totalorder %s688_s30, %s682_s29 }
  0x62   : > { %598 = vtanh.f32 %v215_v12  ;;  %v489_v21 = vld [vmem:[%s952_s4 + $0x11] ss:$8 sm:$0x3]  ;;  %v287_v22 = vmul.f32 0.5, %v488_v19  ;;  %p685_p1 = pneg %p684_p11 }
  0x63   : > { %600 = vtanh.f32 %v246_v14  ;;  %v492_v23 = vld [vmem:[%s952_s4 + $0x12] ss:$8 sm:$0x3]  ;;  %v291_v24 = vmul.f32 0.5, %v489_v21  ;;  %p691_p3 = por %p690_p9, %p689_p0 }
  0x64   : > { %602 = vtanh.f32 %v250_v16  ;;  %v493_v25 = vld [vmem:[%s952_s4 + $0x13] ss:$8 sm:$0x3]  ;;  %v309_v26 = vmul.f32 1.442695, %v492_v23 }
  0x65   : > { %604 = vpow2.f32 %v271_v18  ;;  %v496_v27 = vld [vmem:[%s952_s4 + $0x20] ss:$8 sm:$0x3]  ;;  %v315_v28 = vmul.f32 1.442695, %v493_v25  ;;  %p692_p7 = pnand %p691_p3, %p685_p1 }
  0x66   : > { %606 = vpow2.f32 %v277_v20  ;;  %v497_v29 = vld [vmem:[%s952_s4 + $0x21] ss:$8 sm:$0x3]  ;;  %v325_v31 = vmul.f32 0.5, %v496_v27 }
  0x67   : > { %v589_v30 = vpop.eup %588  ;;  %608 = vtanh.f32 %v287_v22  ;;  %v500_v32 = vld [vmem:[%s952_s4 + $0x22] ss:$8 sm:$0x3]  ;;  %v329_v35 = vmul.f32 0.5, %v497_v29 }
  0x68   : > { %v591_v33 = vpop.eup %590  ;;  %v222_v34 = vmul.f32 0.5, %v589_v30  ;;  %610 = vtanh.f32 %v291_v24  ;;  %v501_v36 = vld [vmem:[%s952_s4 + $0x23] ss:$8 sm:$0x3]  ;;  %v347_v39 = vmul.f32 1.442695, %v500_v32 }
  0x69   : > { %v593_v37 = vpop.eup %592  ;;  %v223_v38 = vmul.f32 0.5, %v591_v33  ;;  %612 = vpow2.f32 %v309_v26  ;;  %v353_v43 = vmul.f32 1.442695, %v501_v36  ;;  %v240_v59 = vld [vmem:[#allocation5] ss:$2 sm:$0x3] }
  0x6a   : > { %v595_v40 = vpop.eup %594  ;;  %v228_v41 = vadd.f32 0.5, %v222_v34  ;;  %v224_v42 = vmul.f32 0.5, %v593_v37  ;;  %614 = vpow2.f32 %v315_v28  ;;  %v242_v0 = vld [vmem:[#allocation5 + $0x1] ss:$2 sm:$0x3] }
  0x6b   : > { %v597_v44 = vpop.eup %596  ;;  %v229_v45 = vadd.f32 0.5, %v223_v38  ;;  %v225_v46 = vmul.f32 0.5, %v595_v40  ;;  %616 = vtanh.f32 %v325_v31 }
  0x6c   : > { %v599_v48 = vpop.eup %598  ;;  %234 = vst [vmem:[%s982_s18] sm:$0xff] %v228_v41  ;;  %v230_v49 = vadd.f32 0.5, %v224_v42  ;;  %v226_v50 = vmul.f32 0.5, %v597_v44  ;;  %618 = vtanh.f32 %v329_v35 }
  0x6d   : > { %v601_v51 = vpop.eup %600  ;;  %235 = vst [vmem:[%s982_s18 + $0x8] sm:$0xff] %v229_v45  ;;  %v231_v52 = vadd.f32 0.5, %v225_v46  ;;  %v227_v53 = vmul.f32 0.5, %v599_v48  ;;  %620 = vpow2.f32 %v347_v39 }
  0x6e   : > { %v603_v54 = vpop.eup %602  ;;  %236 = vst [vmem:[%s982_s18 + $0x10] sm:$0xff] %v230_v49  ;;  %v232_v55 = vadd.f32 0.5, %v226_v50  ;;  %v248_v56 = vmul.f32 0.5, %v601_v51  ;;  %622 = vpow2.f32 %v353_v43 }
  0x6f   : > { %v605_v57 = vpop.eup %604  ;;  %237 = vst [vmem:[%s982_s18 + $0x18] sm:$0xff] %v231_v52  ;;  %v233_v58 = vadd.f32 0.5, %v227_v53  ;;  %v252_v61 = vmul.f32 0.5, %v603_v54 }
  0x70   : > { %v607_v62 = vpop.eup %606  ;;  %238 = vst [vmem:[%s982_s18 + $0x20] sm:$0xff] %v232_v55  ;;  %v249_v63 = vadd.f32 0.5, %v248_v56  ;;  %v273_v1 = vmul.f32 10.0, %v605_v57 }
  0x71   : > { %v609_v2 = vpop.eup %608  ;;  %239 = vst [vmem:[%s982_s18 + $0x28] sm:$0xff] %v233_v58  ;;  %v253_v3 = vadd.f32 0.5, %v252_v61  ;;  %v279_v4 = vmul.f32 13.0, %v607_v62 }
  0x72   : > { %v611_v5 = vpop.eup %610  ;;  %v254_v6 = vadd.f32 %v249_v63, %v240_v59  ;;  %486 = vst.msk [vmem:[%s982_s18 + $0x2] ss:$8 sm:$0x3] %vm988_vm0, %v273_v1  ;;  %v289_v7 = vmul.f32 0.5, %v609_v2 }
  0x73   : > { %v613_v8 = vpop.eup %612  ;;  %v262_v9 = vadd.f32 %v253_v3, %v242_v0  ;;  %487 = vst.msk [vmem:[%s982_s18 + $0x3] ss:$8 sm:$0x3] %vm988_vm0, %v279_v4  ;;  %v293_v10 = vmul.f32 0.5, %v611_v5 }
  0x74   : > { %v615_v11 = vpop.eup %614  ;;  %v255_v12 = vmul.f32 8.0, %v254_v6  ;;  %v290_v13 = vadd.f32 0.5, %v289_v7  ;;  %v311_v14 = vmul.f32 16.0, %v613_v8 }
  0x75   : > { %v617_v15 = vpop.eup %616  ;;  %v263_v16 = vmul.f32 8.0, %v262_v9  ;;  %v294_v17 = vadd.f32 0.5, %v293_v10  ;;  %v317_v18 = vmul.f32 30.0, %v615_v11 }
  0x76   : > { %v619_v19 = vpop.eup %618  ;;  %260 = vst.msk [vmem:[%s982_s18] ss:$8 sm:$0x3] %vm988_vm0, %v255_v12  ;;  %v295_v20 = vadd.f32 %v290_v13, %v240_v59  ;;  %494 = vst.msk [vmem:[%s982_s18 + $0x12] ss:$8 sm:$0x3] %vm988_vm0, %v311_v14 }
  0x77   : > { %v327_v21 = vmul.f32 0.5, %v617_v15  ;;  %v621_v22 = vpop.eup %620  ;;  %483 = vst.msk [vmem:[%s982_s18 + $0x1] ss:$8 sm:$0x3] %vm988_vm0, %v263_v16  ;;  %v300_v23 = vadd.f32 %v294_v17, %v242_v0  ;;  %v331_v24 = vmul.f32 0.5, %v619_v19 }
  0x78   : > { %495 = vst.msk [vmem:[%s982_s18 + $0x13] ss:$8 sm:$0x3] %vm988_vm0, %v317_v18  ;;  %v623_v25 = vpop.eup %622  ;;  %v296_v26 = vmul.f32 8.0, %v295_v20  ;;  %v349_v28 = vmul.f32 33.0, %v621_v22 }
  0x79   : > { %v328_v27 = vadd.f32 0.5, %v327_v21  ;;  %v301_v29 = vmul.f32 8.0, %v300_v23  ;;  %v332_v30 = vadd.f32 0.5, %v331_v24  ;;  %v355_v31 = vmul.f32 23.0, %v623_v25 }
  0x7a   : > { %490 = vst.msk [vmem:[%s982_s18 + $0x10] ss:$8 sm:$0x3] %vm988_vm0, %v296_v26  ;;  %502 = vst.msk [vmem:[%s982_s18 + $0x22] ss:$8 sm:$0x3] %vm988_vm0, %v349_v28 }
  0x7b   : > { %v333_v32 = vadd.f32 %v328_v27, %v240_v59  ;;  %491 = vst.msk [vmem:[%s982_s18 + $0x11] ss:$8 sm:$0x3] %vm988_vm0, %v301_v29  ;;  %v338_v33 = vadd.f32 %v332_v30, %v242_v0  ;;  %503 = vst.msk [vmem:[%s982_s18 + $0x23] ss:$8 sm:$0x3] %vm988_vm0, %v355_v31 }
  0x7d   : > { %v334_v34 = vmul.f32 8.0, %v333_v32  ;;  %v339_v35 = vmul.f32 8.0, %v338_v33 }
  0x7f   : > { %498 = vst.msk [vmem:[%s982_s18 + $0x20] ss:$8 sm:$0x3] %vm988_vm0, %v334_v34  ;;  %499 = vst.msk [vmem:[%s982_s18 + $0x21] ss:$8 sm:$0x3] %vm988_vm0, %v339_v35 }
  0x80   : > { %695 = shalt.err (!%p692_p7)
}
  0x81   : > { %s696_s27 = scalar_lea.hbm %s1031_s7, 768  ;;  %s700_s16 = scalar_lea.hbm %s1088_s2, 1536 }
  0x82   : > { %p697_p13 = scmp.ne.s32.totalorder %s1031_s7, %s696_s27  ;;  %p701_p12 = scmp.lt.u32.totalorder %s1031_s7, %s1088_s2 }
  0x83   : > { %p702_p4 = scmp.lt.u32.totalorder %s700_s16, %s696_s27  ;;  %p704_p5 = scmp.lt.u32.totalorder %s696_s27, %s1031_s7 }
  0x84   : > { %p698_p2 = pnand %p697_p13, %p1111_p10 }
  0x85   : > { %p703_p8 = por %p702_p4, %p701_p12 }
  0x86   : > { %p699_p6 = pneg %p698_p2 }
  0x87   : > { %p705_p11 = por %p704_p5, %p703_p8 }
  0x89   : > { %p706_p1 = pnand %p705_p11, %p699_p6 }
  0x8b   : > { %709 = shalt.err (!%p706_p1)
}
  0x8c   : > { %s775_s4 = smov 256   ;;  %s776_s18 = smov 16  }
  0x8d   : > { %517 = dma.vmem_to_hbm [thread:$0]  (%p1111_p10), %s1026_s23, 768, %s1031_s7, %s360_s15, %s775_s4, %s775_s4, %s776_s18  }
  0x8e PF: > { %s390_s20 = sand.u32 1, %s748_s9   ;;  %p1112_p0 = scmp.ne.s32.totalorder %s1099_s22, 0 }
  0x8f   : > { %p1113_p9 = scmp.ge.s32.totalorder %s768_s14, 2  ;;  %s391_s12 = scalar_lea.sflag [#allocation4], %s390_s20 }
  0x91   : > { %p528_p3 = pnand %p1113_p9, %p1112_p0 }
  0x93   : > { %743 = dma.done.wait (!%p528_p3), %s391_s12, 768  }
  0x94   : > { %745 = vsyncadd (!%p528_p3), %s391_s12, 4294966528  ;;  %s19_s14 = sadd.s32 1, %s768_s14   ;;  %s1114_s9 = smov %s752_s10 }
  0x95   : > { %p16_p7 = scmp.ge.s32.totalorder %s19_s14, 4   ;;  %s1115_s10 = smov %s756_s11 }
  0x96   : > { %s1116_s11 = smov %s911_s25  ;;  %s1117_s12 = smov %s764_s13 }
  0x97   : > { %s1118_s13 = smov %s1120_s28  ;;  %18 = sbr.rel (!%p16_p7) target bundleno = 7 (0x7), region = 101 }
  0x9e   :  { %396 = vsyncpa [#allocation3], 1 }
  0x9f   :  { %398 = vsyncpa [#allocation3 + $0x1], 1 }
  0xa0   :  { %399 = vsyncpa [#allocation6], 1 }
  0xa1   :  { %400 = vsyncpa [#allocation4], 1 }
  0xa2   :  { %402 = vsyncpa [#allocation4 + $0x1], 1 }

</bundles_post_ra>
